<compile_context>
chip_gen: v7x
topology: tpu7x:2x2x1
jax: 0.10.0
libtpu: 0.0.40
codegen_flags: <defaults>
</compile_context>

<pallas_src>
import functools

import jax
import jax.numpy as jnp
from jax.experimental import pallas as pl
from jax.experimental.pallas import tpu as pltpu


def _round_up(x, m):
    return ((x + m - 1) // m) * m


# --------------------------------------------------------------------------
# Kernel
# --------------------------------------------------------------------------
def _decoder_kernel(x_ref, w_ref, b_ref, o_ref, *, n_hidden, d_in, p, d_out,
                    mxu_bf16):
    """Fused decoder forward for one batch tile.

    x_ref : (Bt, d_in)           input tile
    w_ref : (n_hidden+1, SUB, P) zero-padded weight slab (BN already folded)
    b_ref : (n_hidden+1, 1, P)   zero-padded bias slab
    o_ref : (Bt, d_out)          output tile
    """
    def mm(a, w):
        if mxu_bf16:
            a = a.astype(jnp.bfloat16)
            w = w.astype(jnp.bfloat16)
        return jnp.dot(a, w, preferred_element_type=jnp.float32)

    y = x_ref[...].astype(jnp.float32)                          # (Bt, d_in)

    # Hidden layer 0 (its trailing BN is folded into the next layer's weights).
    y = jnp.maximum(mm(y, w_ref[0, :d_in, :]) + b_ref[0], 0.0)  # (Bt, P)

    # Remaining hidden layers: Linear (+folded BN of previous layer) -> ReLU.
    # Dropout is identity in eval mode.
    for i in range(1, n_hidden):
        y = jnp.maximum(mm(y, w_ref[i, :p, :]) + b_ref[i], 0.0)

    # Final Linear (last BN folded in), no activation.
    y = mm(y, w_ref[n_hidden, :p, :]) + b_ref[n_hidden]
    o_ref[...] = y[:, :d_out].astype(o_ref.dtype)


# --------------------------------------------------------------------------
# Parameter preparation (host-side precompute): BN fold + slab packing
# --------------------------------------------------------------------------
def fold_and_pack_decoder_params(params):
    """Fold eval-mode BatchNorm into the following Linear and pack everything
    into two zero-padded slabs."""
    eps = params["eps"]
    hidden = params["hidden"]
    final = params["final"]
    n_hidden = len(hidden)

    ws = [layer["w"] for layer in hidden] + [final["w"]]
    bs = [layer["b"] for layer in hidden] + [final["b"]]

    # Fold BN_i (after ReLU/Dropout of block i) into Linear_{i+1}:
    #   (h*scale + shift) @ W + b  ==  h @ (scale^T * W) + (shift @ W + b)
    for i, layer in enumerate(hidden):
        scale = layer["gamma"] / jnp.sqrt(layer["running_var"] + eps)  # (1, d)
        shift = layer["beta"] - layer["running_mean"] * scale          # (1, d)
        w_next = ws[i + 1]
        bs[i + 1] = bs[i + 1] + shift @ w_next
        ws[i + 1] = scale.reshape(-1, 1) * w_next

    d_in = ws[0].shape[0]
    d_out = ws[-1].shape[1]
    n_tot = n_hidden + 1
    p = _round_up(max(w.shape[1] for w in ws), 128)     # padded lane width
    sub = max(p, _round_up(d_in, 8))                    # padded contraction dim

    w_slab = jnp.zeros((n_tot, sub, p), jnp.float32)
    b_slab = jnp.zeros((n_tot, 1, p), jnp.float32)
    for i, (w, b) in enumerate(zip(ws, bs)):
        w_slab = w_slab.at[i, : w.shape[0], : w.shape[1]].set(w)
        b_slab = b_slab.at[i, :, : b.shape[1]].set(b)

    macs_per_row = sum(w.shape[0] * w.shape[1] for w in ws)
    return dict(
        w_slab=w_slab, b_slab=b_slab,
        n_hidden=n_hidden, d_in=d_in, d_out=d_out, p=p, sub=sub,
        macs_per_row=macs_per_row,
    )


# --------------------------------------------------------------------------
# Wrapper
# --------------------------------------------------------------------------
def _choose_batch_tile(batch, max_bt):
    if batch <= max_bt:
        return batch                      # single grid step
    steps = pl.cdiv(batch, max_bt)
    if steps % 2:                         # even step count -> v7x megacore split
        steps += 1
    return _round_up(pl.cdiv(batch, steps), 8)


def decoder_forward(x, packed, *, out_dtype=jnp.float32, mxu_bf16=False,
                    max_batch_tile=2048):
    """Single fused pallas_call over the whole decoder."""
    w_slab, b_slab = packed["w_slab"], packed["b_slab"]
    n_hidden = packed["n_hidden"]
    d_in, d_out = packed["d_in"], packed["d_out"]
    p, sub = packed["p"], packed["sub"]
    n_tot = n_hidden + 1

    batch = x.shape[0]
    assert x.shape[1] == d_in

    # --- batch tiling (cdiv + zero padding; no divisibility requirement) ---
    bt = _choose_batch_tile(batch, max_batch_tile)
    grid_steps = pl.cdiv(batch, bt)
    b_pad = grid_steps * bt
    x_in = x if b_pad == batch else jnp.pad(x, ((0, b_pad - batch), (0, 0)))

    # --- scheduler hints / explicit VMEM budget ---
    flops = 2 * batch * packed["macs_per_row"]
    param_bytes = 4 * (n_tot * sub * p + n_tot * p)
    bytes_accessed = 4 * batch * (d_in + d_out) + param_bytes
    cost = pl.CostEstimate(flops=flops, transcendentals=0,
                           bytes_accessed=bytes_accessed)

    vmem_est = 4 * (2 * bt * d_in + 2 * bt * d_out        # x / out double-buffered
                    + 2 * (n_tot * sub * p + n_tot * p)   # param slabs
                    + 6 * bt * p)                         # live f32 intermediates
    vmem_limit = int(min(max(2 * vmem_est, 16 * 2**20), 32 * 2**20))

    kernel = functools.partial(_decoder_kernel, n_hidden=n_hidden, d_in=d_in,
                               p=p, d_out=d_out, mxu_bf16=mxu_bf16)

    out = pl.pallas_call(
        kernel,
        out_shape=jax.ShapeDtypeStruct((b_pad, d_out), out_dtype),
        grid=(grid_steps,),
        in_specs=[
            pl.BlockSpec((bt, d_in), lambda i: (i, 0)),
            pl.BlockSpec((n_tot, sub, p), lambda i: (0, 0, 0)),
            pl.BlockSpec((n_tot, 1, p), lambda i: (0, 0, 0)),
        ],
        out_specs=pl.BlockSpec((bt, d_out), lambda i: (i, 0)),
        compiler_params=pltpu.CompilerParams(
            dimension_semantics=("parallel",),   # batch axis independent
            vmem_limit_bytes=vmem_limit),
        cost_estimate=cost,
    )(x_in, w_slab, b_slab)

    return out[:batch] if b_pad != batch else out


# --------------------------------------------------------------------------
# Synthetic params + plain-JAX reference (literal eval-mode PyTorch semantics)
# --------------------------------------------------------------------------
def init_decoder_params(key, layer_dims, output_dim, eps=1e-5):
    """layer_dims e.g. [16, 32, 64] -> Linear(16,32)+BN(32), Linear(32,64)+BN(64),
    then final Linear(64, output_dim)."""
    hidden = []
    for i in range(len(layer_dims) - 1):
        din, dout = layer_dims[i], layer_dims[i + 1]
        key, kw, kb, kg, kbe, km, kv = jax.random.split(key, 7)
        hidden.append(dict(
            w=jax.random.normal(kw, (din, dout), jnp.float32) / jnp.sqrt(din),
            b=jax.random.normal(kb, (1, dout), jnp.float32) * 0.05,
            gamma=1.0 + 0.1 * jax.random.normal(kg, (1, dout), jnp.float32),
            beta=0.1 * jax.random.normal(kbe, (1, dout), jnp.float32),
            running_mean=0.1 * jax.random.normal(km, (1, dout), jnp.float32),
            running_var=1.0 + 0.1 * jax.random.uniform(kv, (1, dout), jnp.float32),
        ))
    din = layer_dims[-1]
    key, kw, kb = jax.random.split(key, 3)
    final = dict(
        w=jax.random.normal(kw, (din, output_dim), jnp.float32) / jnp.sqrt(din),
        b=jax.random.normal(kb, (1, output_dim), jnp.float32) * 0.05,
    )
    return dict(hidden=hidden, final=final, eps=eps)


def decoder_reference(x, params):
    """Linear -> ReLU -> Dropout(eval=id) -> BatchNorm(running stats), then final Linear."""
    eps = params["eps"]
    y = x
    for layer in params["hidden"]:
        y = y @ layer["w"] + layer["b"]
        y = jnp.maximum(y, 0.0)
        y = (y - layer["running_mean"]) / jnp.sqrt(layer["running_var"] + eps)
        y = y * layer["gamma"] + layer["beta"]
    return y @ params["final"]["w"] + params["final"]["b"]


# --------------------------------------------------------------------------
if __name__ == "__main__":
    key = jax.random.PRNGKey(0)
    kx, kp, kx2 = jax.random.split(key, 3)

    # Decoder mirrors the encoder: latent 16 -> 32 -> 64, then final Linear to
    # output_dimensionality = 128.
    batch = 8
    layer_dims = [16, 32, 64]
    output_dim = 128

    x = jax.random.normal(kx, (batch, layer_dims[0]), jnp.float32)
    params = init_decoder_params(kp, layer_dims, output_dim)
    packed = fold_and_pack_decoder_params(params)

    out = jax.block_until_ready(decoder_forward(x, packed))
    ref = decoder_reference(x, params)
    assert out.shape == (batch, output_dim)
    assert jnp.allclose(out, ref, atol=1e-4, rtol=1e-4), "mismatch vs reference"

    # Exercise the multi-step / ragged-batch path (even grid steps + padding).
    x2 = jax.random.normal(kx2, (600, layer_dims[0]), jnp.float32)
    out2 = jax.block_until_ready(
        decoder_forward(x2, packed, max_batch_tile=256))
    ref2 = decoder_reference(x2, params)
    assert out2.shape == (600, output_dim)
    assert jnp.allclose(out2, ref2, atol=1e-4, rtol=1e-4), "mismatch (tiled) vs reference"

    print("KERNEL_OK")
</pallas_src>

<mosaic_0001>
module attributes {stable_mosaic.version = 11 : i64} {
  func.func @_decoder_kernel(%arg0: i32, %arg1: memref<8x16xf32, #tpu.memory_space<vmem>>, %arg2: memref<3x128x128xf32, #tpu.memory_space<vmem>>, %arg3: memref<3x1x128xf32, #tpu.memory_space<vmem>>, %arg4: memref<8x128xf32, #tpu.memory_space<vmem>>) attributes {dimension_semantics = [#tpu.dimension_semantics<parallel>], iteration_bounds = array<i64: 1>, scalar_prefetch = 0 : i64, scratch_operands = 0 : i64, tpu.core_type = #tpu.core_type<tc>, window_params = [{transform_indices = @transform_0, window_bounds = array<i64: 8, 16>}, {pipeline_mode = #tpu.pipeline_mode<synchronous>, transform_indices = @transform_1, window_bounds = array<i64: 3, 128, 128>}, {pipeline_mode = #tpu.pipeline_mode<synchronous>, transform_indices = @transform_2, window_bounds = array<i64: 3, 1, 128>}, {transform_indices = @transform_3, window_bounds = array<i64: 8, 128>}]} {
    %c0 = arith.constant 0 : index
    %c0_0 = arith.constant 0 : index
    %0 = vector.load %arg1[%c0, %c0_0] : memref<8x16xf32, #tpu.memory_space<vmem>>, vector<8x16xf32>
    %c0_1 = arith.constant 0 : index
    %c0_2 = arith.constant 0 : index
    %c0_3 = arith.constant 0 : index
    %1 = vector.load %arg2[%c0_1, %c0_2, %c0_3] : memref<3x128x128xf32, #tpu.memory_space<vmem>>, vector<1x16x128xf32>
    %2 = vector.shape_cast %1 : vector<1x16x128xf32> to vector<16x128xf32>
    %cst = arith.constant dense<0.000000e+00> : vector<8x128xf32>
    %3 = tpu.matmul %0, %2, %cst {dimension_numbers = #tpu.dot_dimension_numbers<[1], [0], [0], [1], [0, 0, 1, 1], [], []>} : vector<8x16xf32>, vector<16x128xf32>, vector<8x128xf32> -> vector<8x128xf32>
    %c0_4 = arith.constant 0 : index
    %c0_5 = arith.constant 0 : index
    %c0_6 = arith.constant 0 : index
    %4 = vector.load %arg3[%c0_4, %c0_5, %c0_6] : memref<3x1x128xf32, #tpu.memory_space<vmem>>, vector<1x1x128xf32>
    %5 = vector.shape_cast %4 : vector<1x1x128xf32> to vector<1x128xf32>
    %6 = vector.broadcast %5 : vector<1x128xf32> to vector<8x128xf32>
    %7 = arith.addf %3, %6 : vector<8x128xf32>
    %cst_7 = arith.constant 0.000000e+00 : f32
    %8 = vector.broadcast %cst_7 : f32 to vector<8x128xf32>
    %9 = arith.maximumf %7, %8 : vector<8x128xf32>
    %c1 = arith.constant 1 : index
    %c0_8 = arith.constant 0 : index
    %c0_9 = arith.constant 0 : index
    %10 = vector.load %arg2[%c1, %c0_8, %c0_9] : memref<3x128x128xf32, #tpu.memory_space<vmem>>, vector<1x128x128xf32>
    %11 = vector.shape_cast %10 : vector<1x128x128xf32> to vector<128x128xf32>
    %cst_10 = arith.constant dense<0.000000e+00> : vector<8x128xf32>
    %12 = tpu.matmul %9, %11, %cst_10 {dimension_numbers = #tpu.dot_dimension_numbers<[1], [0], [0], [1], [0, 0, 1, 1], [], []>} : vector<8x128xf32>, vector<128x128xf32>, vector<8x128xf32> -> vector<8x128xf32>
    %c1_11 = arith.constant 1 : index
    %c0_12 = arith.constant 0 : index
    %c0_13 = arith.constant 0 : index
    %13 = vector.load %arg3[%c1_11, %c0_12, %c0_13] : memref<3x1x128xf32, #tpu.memory_space<vmem>>, vector<1x1x128xf32>
    %14 = vector.shape_cast %13 : vector<1x1x128xf32> to vector<1x128xf32>
    %15 = vector.broadcast %14 : vector<1x128xf32> to vector<8x128xf32>
    %16 = arith.addf %12, %15 : vector<8x128xf32>
    %cst_14 = arith.constant 0.000000e+00 : f32
    %17 = vector.broadcast %cst_14 : f32 to vector<8x128xf32>
    %18 = arith.maximumf %16, %17 : vector<8x128xf32>
    %c2 = arith.constant 2 : index
    %c0_15 = arith.constant 0 : index
    %c0_16 = arith.constant 0 : index
    %19 = vector.load %arg2[%c2, %c0_15, %c0_16] : memref<3x128x128xf32, #tpu.memory_space<vmem>>, vector<1x128x128xf32>
    %20 = vector.shape_cast %19 : vector<1x128x128xf32> to vector<128x128xf32>
    %cst_17 = arith.constant dense<0.000000e+00> : vector<8x128xf32>
    %21 = tpu.matmul %18, %20, %cst_17 {dimension_numbers = #tpu.dot_dimension_numbers<[1], [0], [0], [1], [0, 0, 1, 1], [], []>} : vector<8x128xf32>, vector<128x128xf32>, vector<8x128xf32> -> vector<8x128xf32>
    %c2_18 = arith.constant 2 : index
    %c0_19 = arith.constant 0 : index
    %c0_20 = arith.constant 0 : index
    %22 = vector.load %arg3[%c2_18, %c0_19, %c0_20] : memref<3x1x128xf32, #tpu.memory_space<vmem>>, vector<1x1x128xf32>
    %23 = vector.shape_cast %22 : vector<1x1x128xf32> to vector<1x128xf32>
    %24 = vector.broadcast %23 : vector<1x128xf32> to vector<8x128xf32>
    %25 = arith.addf %21, %24 : vector<8x128xf32>
    %c0_21 = arith.constant 0 : index
    %c0_22 = arith.constant 0 : index
    %26 = vector.load %arg4[%c0_21, %c0_22] : memref<8x128xf32, #tpu.memory_space<vmem>>, vector<8x128xf32>
    tpu.vector_store %arg4[%c0_21, %c0_22], %25 {strides = array<i32>} : memref<8x128xf32, #tpu.memory_space<vmem>>, vector<8x128xf32>,
    return
  }
  func.func @transform_0(%arg0: i32) -> (i32, i32) {
    %c0_i32 = arith.constant 0 : i32
    %c0_i32_0 = arith.constant 0 : i32
    return %arg0, %c0_i32 : i32, i32
  }
  func.func @transform_1(%arg0: i32) -> (i32, i32, i32) {
    %c0_i32 = arith.constant 0 : i32
    %c0_i32_0 = arith.constant 0 : i32
    %c0_i32_1 = arith.constant 0 : i32
    %c0_i32_2 = arith.constant 0 : i32
    return %c0_i32, %c0_i32_0, %c0_i32_1 : i32, i32, i32
  }
  func.func @transform_2(%arg0: i32) -> (i32, i32, i32) {
    %c0_i32 = arith.constant 0 : i32
    %c0_i32_0 = arith.constant 0 : i32
    %c0_i32_1 = arith.constant 0 : i32
    %c0_i32_2 = arith.constant 0 : i32
    return %c0_i32, %c0_i32_0, %c0_i32_1 : i32, i32, i32
  }
  func.func @transform_3(%arg0: i32) -> (i32, i32) {
    %c0_i32 = arith.constant 0 : i32
    %c0_i32_0 = arith.constant 0 : i32
    return %arg0, %c0_i32 : i32, i32
  }
}

</mosaic_0001>

<bundles_post_ra>
// kernel: tpu_custom_call.1
= control target key start
LH: loop header
LB: loop body
LE: loop exit
PB: predicated region body
PF: predicated region fallthrough
CT: control target
= control target key end

     0   :  { %8 = vsyncpa [#allocation3], 0  ;;  %s685_s0 = inlined_call_operand.hbm [shape: f32[8,16], index: 0, kind: input, shape index: {}]   ;;  %s686_s1 = inlined_call_operand.hbm [shape: f32[3,128,128], index: 1, kind: input, shape index: {}]   ;;  %s687_s2 = inlined_call_operand.vmem [shape: f32[3,1,128], index: 2, kind: input, shape index: {}]   ;;  %s688_s3 = inlined_call_operand.hbm [shape: f32[8,128], index: 3, kind: output, shape index: {}]  }
   0x1   :  { %9 = vsyncpa [#allocation6], 0 }
   0x2   :  { %10 = vsyncpa [#allocation4], 0  ;;  %s585_s12 = smov [#allocation2]   ;;  %s586_s14 = smov [#allocation5]  }
   0x3   :  { %s17_s13 = sshll.u32 %s585_s12, 4  ;;  %s26_s15 = sshll.u32 %s586_s14, 4  ;;  %s18_s13 = int_to_ptr.vmem [resolvable:$true] %s17_s13  ;;  %s613_s15 = int_to_ptr.vmem [resolvable:$true] %s26_s15 }
   0x4   :  { %s513_s18 = scalar_lea.hbm %s685_s0, 128 }
   0x5   :  { %p514_p0 = scmp.ne.s32.totalorder %s685_s0, %s513_s18  ;;  %p517_p1 = scmp.lt.u32.totalorder %s513_s18, %s685_s0 }
   0x7   :  { %p519_p2 = pnand %p517_p1, %p514_p0 }
   0x9   :  { %522 = shalt.err (!%p519_p2)
}
   0xa   :  { %s523_s23 = scalar_lea.vmem %s18_s13, 128  ;;  %p528_p4 = scmp.lt.s32.totalorder %s18_s13, %s18_s13 }
   0xb   :  { %p524_p3 = scmp.ne.s32.totalorder %s18_s13, %s523_s23  ;;  %p529_p5 = scmp.lt.s32.totalorder %s523_s23, %s523_s23 }
   0xd   :  { %p530_p6 = por %p529_p5, %p528_p4 }
   0xf   :  { %p531_p7 = pnand %p530_p6, %p524_p3 }
  0x11   :  { %534 = shalt.err (!%p531_p7)
}
  0x12   :  { %20 = dma.hbm_to_vmem [thread:$0]  %s685_s0, 128, %s18_s13, [#allocation3]  }
  0x13   :  { %s535_s28 = scalar_lea.hbm %s686_s1, 6144 }
  0x14   :  { %p536_p8 = scmp.ne.s32.totalorder %s686_s1, %s535_s28  ;;  %p539_p9 = scmp.lt.u32.totalorder %s535_s28, %s686_s1 }
  0x16   :  { %p541_p10 = pnand %p539_p9, %p536_p8 }
  0x18   :  { %544 = shalt.err (!%p541_p10)
}
  0x19   :  { %s545_s6 = scalar_lea.vmem %s613_s15, 6144  ;;  %p550_p12 = scmp.lt.s32.totalorder %s613_s15, %s613_s15 }
  0x1a   :  { %p546_p11 = scmp.ne.s32.totalorder %s613_s15, %s545_s6  ;;  %p551_p13 = scmp.lt.s32.totalorder %s545_s6, %s545_s6 }
  0x1c   :  { %p552_p0 = por %p551_p13, %p550_p12 }
  0x1e   :  { %p553_p1 = pnand %p552_p0, %p546_p11 }
  0x20   :  { %556 = shalt.err (!%p553_p1)
}
  0x21   :  { %s587_s0 = smov 128   ;;  %s588_s7 = smov 8  }
  0x22   :  { %32 = dma.hbm_to_vmem [thread:$0]  %s686_s1, 6144, %s613_s15, [#allocation6], %s587_s0, %s587_s0, %s588_s7  }
  0x23   :  { %579 = dma.done.wait [#allocation3], 128  }
  0x24   :  { %580 = vsyncadd [#allocation3], 4294967168 }
  0x25   :  { %581 = dma.done.wait [#allocation6], 6144  }
  0x26   :  { %582 = vsyncadd [#allocation6], 4294961152  ;;  %v589_v0 = vmov 0.0|0.0   ;;  %vm590_vm0 = vmmov 0   ;;  %v591_v1 = vmov 0.0   ;;  %v42_v2 = vld [vmem:[#allocation5] sm:$0xff] }
  0x27   :  { %454 = vmatprep.subr.bf16.mxu0 %v589_v0  ;;  %381 = vmatprep.mubr.msk.f32.mxu0 %vm590_vm0, %v591_v1  ;;  %v43_v3 = vld [vmem:[#allocation5 + $0x8] sm:$0xff]  ;;  %v127_v5 = vld [vmem:[#allocation5 + $0x80] sm:$0xff]  ;;  %v129_v7 = vld [vmem:[#allocation5 + $0x90] sm:$0xff]  ;;  %vm51_vm1 = vcmask 130048   ;;  %s592_s15 = smov [#allocation7]  }
  0x28   :  { %457 = vmatprep.subr.bf16.mxu1 %v589_v0  ;;  %416 = vmatprep.mubr.msk.f32.mxu1 %vm590_vm0, %v591_v1  ;;  %v455_v4 = vpack.c.bf16 %v43_v3, %v42_v2  ;;  %v128_v6 = vld [vmem:[#allocation5 + $0x88] sm:$0xff]  ;;  %v130_v9 = vld [vmem:[#allocation5 + $0x98] sm:$0xff]  ;;  %v131_v12 = vld [vmem:[#allocation5 + $0xa0] sm:$0xff]  ;;  %s324_s16 = sshll.u32 %s592_s15, 4  ;;  %s325_s16 = int_to_ptr.vmem [resolvable:$true] %s324_s16 }
  0x29   :  { %v458_v8 = vpack.c.bf16 %v128_v6, %v127_v5  ;;  %v41_v10 = vld [vmem:[#allocation2] sm:$0xff]  ;;  %v461_v11 = vpack.c.bf16 %v130_v9, %v129_v7  ;;  %v132_v13 = vld [vmem:[#allocation5 + $0xa8] sm:$0xff]  ;;  %v133_v15 = vld [vmem:[#allocation5 + $0xb0] sm:$0xff]  ;;  %s557_s17 = scalar_lea.vmem %s325_s16, 128  ;;  %p562_p3 = scmp.lt.s32.totalorder %s325_s16, %s325_s16 }
  0x2a   :  { %456 = vmatpush3.bf16.msra.mxu0 %v455_v4  ;;  %v464_v14 = vpack.c.bf16 %v132_v13, %v131_v12  ;;  %v134_v16 = vld [vmem:[#allocation5 + $0xb8] sm:$0xff]  ;;  %v135_v18 = vld [vmem:[#allocation5 + $0xc0] sm:$0xff]  ;;  %v136_v19 = vld [vmem:[#allocation5 + $0xc8] sm:$0xff]  ;;  %p558_p2 = scmp.ne.s32.totalorder %s325_s16, %s557_s17  ;;  %p563_p4 = scmp.lt.s32.totalorder %s557_s17, %s557_s17 }
  0x2b   :  { %459 = vmatpush3.bf16.msra.mxu1 %v458_v8  ;;  %481 = vmatprep.subr.bf16.mxu0 %v589_v0  ;;  %v467_v17 = vpack.c.bf16 %v134_v16, %v133_v15  ;;  %v470_v20 = vpack.c.bf16 %v136_v19, %v135_v18  ;;  %v137_v21 = vld [vmem:[#allocation5 + $0xd0] sm:$0xff]  ;;  %v138_v22 = vld [vmem:[#allocation5 + $0xd8] sm:$0xff]  ;;  %v139_v24 = vld [vmem:[#allocation5 + $0xe0] sm:$0xff] }
  0x2c   :  { %460 = vmatprep.subr.bf16.mxu1 %v589_v0  ;;  %v473_v23 = vpack.c.bf16 %v138_v22, %v137_v21  ;;  %v140_v25 = vld [vmem:[#allocation5 + $0xe8] sm:$0xff]  ;;  %v141_v27 = vld [vmem:[#allocation5 + $0xf0] sm:$0xff]  ;;  %v142_v28 = vld [vmem:[#allocation5 + $0xf8] sm:$0xff]  ;;  %p564_p5 = por %p563_p4, %p562_p3 }
  0x2d   :  { %382 = vmatmul.mubr.msk.f32.vlgmr.msra.gmra.mrb[0].mxu0 %vm51_vm1, %v41_v10  ;;  %v476_v26 = vpack.c.bf16 %v140_v25, %v139_v24  ;;  %v479_v29 = vpack.c.bf16 %v142_v28, %v141_v27  ;;  %v223_v30 = vld [vmem:[#allocation5 + $0x100] sm:$0xff]  ;;  %v224_v31 = vld [vmem:[#allocation5 + $0x108] sm:$0xff]  ;;  %v225_v32 = vld [vmem:[#allocation5 + $0x110] sm:$0xff] }
  0x2e   :  { %451 = vmatprep.mubr.msk.f32.mxu0 %vm590_vm0, %v591_v1  ;;  %v482_v33 = vpack.c.bf16 %v224_v31, %v223_v30  ;;  %v226_v34 = vld [vmem:[#allocation5 + $0x118] sm:$0xff]  ;;  %v227_v36 = vld [vmem:[#allocation5 + $0x120] sm:$0xff]  ;;  %v228_v37 = vld [vmem:[#allocation5 + $0x128] sm:$0xff]  ;;  %p565_p6 = pnand %p564_p5, %p558_p2 }
  0x2f   :  { %462 = vmatpush3.bf16.msra.mxu1 %v461_v11  ;;  %v485_v35 = vpack.c.bf16 %v226_v34, %v225_v32  ;;  %v488_v38 = vpack.c.bf16 %v228_v37, %v227_v36  ;;  %v229_v39 = vld [vmem:[#allocation5 + $0x130] sm:$0xff]  ;;  %v230_v40 = vld [vmem:[#allocation5 + $0x138] sm:$0xff]  ;;  %v231_v42 = vld [vmem:[#allocation5 + $0x140] sm:$0xff] }
  0x30   :  { %463 = vmatprep.subr.bf16.mxu1 %v589_v0  ;;  %483 = vmatpush3.bf16.msra.mxu0 %v482_v33  ;;  %v491_v41 = vpack.c.bf16 %v230_v40, %v229_v39  ;;  %v232_v43 = vld [vmem:[#allocation5 + $0x148] sm:$0xff]  ;;  %v233_v45 = vld [vmem:[#allocation5 + $0x150] sm:$0xff]  ;;  %v234_v46 = vld [vmem:[#allocation5 + $0x158] sm:$0xff] }
  0x31   :  { %484 = vmatprep.subr.bf16.mxu0 %v589_v0  ;;  %v494_v44 = vpack.c.bf16 %v232_v43, %v231_v42  ;;  %v497_v47 = vpack.c.bf16 %v234_v46, %v233_v45  ;;  %v235_v48 = vld [vmem:[#allocation5 + $0x160] sm:$0xff]  ;;  %v236_v49 = vld [vmem:[#allocation5 + $0x168] sm:$0xff]  ;;  %v334_v51 = vld [vmem:[%s687_s2] ss:$0 sm:$0xff] }
  0x32   :  { %v500_v50 = vpack.c.bf16 %v236_v49, %v235_v48  ;;  %v237_v56 = vld [vmem:[#allocation5 + $0x170] sm:$0xff]  ;;  %v238_v57 = vld [vmem:[#allocation5 + $0x178] sm:$0xff] }
  0x33   :  { %465 = vmatpush3.bf16.msra.mxu1 %v464_v14  ;;  %v503_v58 = vpack.c.bf16 %v238_v57, %v237_v56  ;;  %v337_v59 = vld [vmem:[%s687_s2 + $0x1] ss:$0 sm:$0xff] }
  0x34   :  { %466 = vmatprep.subr.bf16.mxu1 %v589_v0  ;;  %486 = vmatpush3.bf16.msra.mxu0 %v485_v35 }
  0x35   :  { %487 = vmatprep.subr.bf16.mxu0 %v589_v0 }
  0x37   :  { %468 = vmatpush3.bf16.msra.mxu1 %v467_v17 }
  0x38   :  { %469 = vmatprep.subr.bf16.mxu1 %v589_v0  ;;  %489 = vmatpush3.bf16.msra.mxu0 %v488_v38 }
  0x39   :  { %490 = vmatprep.subr.bf16.mxu0 %v589_v0 }
  0x3b   :  { %471 = vmatpush3.bf16.msra.mxu1 %v470_v20 }
  0x3c   :  { %472 = vmatprep.subr.bf16.mxu1 %v589_v0  ;;  %492 = vmatpush3.bf16.msra.mxu0 %v491_v41 }
  0x3d   :  { %493 = vmatprep.subr.bf16.mxu0 %v589_v0 }
  0x3f   :  { %474 = vmatpush3.bf16.msra.mxu1 %v473_v23 }
  0x40   :  { %475 = vmatprep.subr.bf16.mxu1 %v589_v0  ;;  %495 = vmatpush3.bf16.msra.mxu0 %v494_v44 }
  0x41   :  { %496 = vmatprep.subr.bf16.mxu0 %v589_v0 }
  0x43   :  { %477 = vmatpush3.bf16.msra.mxu1 %v476_v26 }
  0x44   :  { %478 = vmatprep.subr.bf16.mxu1 %v589_v0  ;;  %498 = vmatpush3.bf16.msra.mxu0 %v497_v47 }
  0x45   :  { %499 = vmatprep.subr.bf16.mxu0 %v589_v0 }
  0x47   :  { %480 = vmatpush3.bf16.msra.mxu1 %v479_v29 }
  0x48   :  { %501 = vmatpush3.bf16.msra.mxu0 %v500_v50 }
  0x49   :  { %502 = vmatprep.subr.bf16.mxu0 %v589_v0  ;;  %v339_v0 = vld [vmem:[%s687_s2 + $0x2] ss:$0 sm:$0xff] }
  0x4c   :  { %504 = vmatpush3.bf16.msra.mxu0 %v503_v58 }
 0x100   :  { %v121_v52 = vpop.f32.mrb[0].mxu0 }
 0x101   :  { %v122_v53 = vadd.f32 %v334_v51, %v121_v52  ;;  %v383_v54 = vpop.f32.mrb[1].mxu0 }
 0x103   :  { %v125_v55 = vmax.f32 %v122_v53, 0.0 }
 0x105   :  { %417 = vmatmul.mubr.f32.vlgmr.msra.gmra.mrb[0].mxu1 %v125_v55 }
 0x1d8   :  { %v217_v60 = vpop.f32.mrb[0].mxu1 }
 0x1d9   :  { %v218_v61 = vadd.f32 %v337_v59, %v217_v60  ;;  %v418_v62 = vpop.f32.mrb[1].mxu1 }
 0x1db   :  { %v221_v63 = vmax.f32 %v218_v61, 0.0 }
 0x1dd   :  { %452 = vmatmul.mubr.f32.vlgmr.msra.gmra.mrb[2].mxu0 %v221_v63 }
 0x2b0   :  { %v313_v1 = vpop.f32.mrb[2].mxu0 }
 0x2b1   :  { %v314_v2 = vadd.f32 %v339_v0, %v313_v1  ;;  %v453_v3 = vpop.f32.mrb[3].mxu0 }
 0x2b3   :  { %317 = vst [vmem:[#allocation7] sm:$0xff] %v314_v2 }
 0x2b4   :  { %568 = shalt.err (!%p565_p6)
}
 0x2b5   :  { %s569_s20 = scalar_lea.hbm %s688_s3, 128 }
 0x2b6   :  { %p570_p7 = scmp.ne.s32.totalorder %s688_s3, %s569_s20  ;;  %p573_p8 = scmp.lt.u32.totalorder %s569_s20, %s688_s3 }
 0x2b8   :  { %p575_p9 = pnand %p573_p8, %p570_p7 }
 0x2ba   :  { %578 = shalt.err (!%p575_p9)
}
 0x2bb   :  { %327 = dma.vmem_to_hbm [thread:$0]  %s325_s16, 128, %s688_s3, [#allocation4]  }
 0x2bc   :  { %583 = dma.done.wait [#allocation4], 128  }
 0x2bd   :  { %584 = vsyncadd [#allocation4], 4294967168 }
 0x2be   :  { %331 = vsyncpa [#allocation3], 1 }
 0x2bf   :  { %332 = vsyncpa [#allocation6], 1 }
 0x2c0   :  { %333 = vsyncpa [#allocation4], 1 }

</bundles_post_ra>
